<compile_context>
chip_gen: v5e
topology: v5e:2x2
jax: 0.10.0
libtpu: 0.0.40
codegen_flags: <defaults>
</compile_context>

<pallas_src>
import jax
import jax.numpy as jnp
from jax.experimental import pallas as pl
from jax.experimental.pallas import tpu as pltpu


def attention_kernel(out_ref, ctx_ref, w_in_ref, w_out_a_ref, w_out_b_ref,
                     b_out_ref, yattn_ref):
    Bb, T, D = out_ref.shape
    _, S, E2 = ctx_ref.shape
    cdt = out_ref.dtype                      # compute dtype (f32 or bf16)

    out = out_ref[...]                       # (Bb, T, D)   decoder states
    ctx = ctx_ref[...]                       # (Bb, S, E2)  encoder states

    # context_in = linear_in(context): fold batch -> one MXU call for all rows.
    ctx_in = jnp.dot(ctx.reshape(Bb * S, E2), w_in_ref[...],
                     preferred_element_type=jnp.float32)
    ctx_in = ctx_in.reshape(Bb, S, D).astype(cdt)

    # attn scores = bmm(output, context_in^T): contract last dims directly
    # (no explicit transpose -> no XLU relayout).
    scores = jnp.einsum("btd,bsd->bts", out, ctx_in,
                        preferred_element_type=jnp.float32)       # (Bb, T, S)

    # (masked_fill in the reference is a no-op; see NOTE at top of file)

    # Numerically-stable softmax over the last dim (exact divide for parity
    # with the reference; approx reciprocal previously exceeded tolerance).
    scores = scores - jnp.max(scores, axis=-1, keepdims=True)
    e = jnp.exp(scores)
    attn = e / jnp.sum(e, axis=-1, keepdims=True)                 # (Bb, T, S) f32

    # weighted context = bmm(attn, context) -> (Bb, T, E2)
    ctx2 = jnp.einsum("bts,bse->bte", attn.astype(cdt), ctx,
                      preferred_element_type=jnp.float32)

    # linear_out(cat([ctx2, output], -1)) as a split matmul, batch-folded.
    pre = (jnp.dot(ctx2.reshape(Bb * T, E2).astype(cdt), w_out_a_ref[...],
                   preferred_element_type=jnp.float32)
           + jnp.dot(out.reshape(Bb * T, D), w_out_b_ref[...],
                     preferred_element_type=jnp.float32)
           + b_out_ref[...])                                      # (Bb*T, D) f32
    y = jnp.tanh(pre)

    # Single lane-dense(r) output slab: [ y | attn ]  (split for free in wrapper).
    yattn_ref[...] = jnp.concatenate(
        [y, attn.reshape(Bb * T, S)], axis=-1).astype(yattn_ref.dtype)


def _pick_block_b(B, T):
    """Largest divisor of B that is <= min(8, B//2): keeps >=2 grid steps
    (megacore sharding on v7x) and <=8 batch items per step, then falls back
    to the whole batch if the (8,128) output-tile rule would be violated."""
    cap = max(1, min(8, B // 2))
    block_b = 1
    for d in range(cap, 0, -1):
        if B % d == 0:
            block_b = d
            break
    if (block_b * T) % 8 != 0 and block_b != B:
        block_b = B          # single step; output block then equals full array
    return block_b


def attention_forward(output, context, mask, w_in, w_out, b_out, *,
                      block_b=None, compute_dtype=jnp.float32):
    """output: (B,T,D), context: (B,S,E2), mask: (B,T,S) bool (unused, see NOTE).
       w_in: (D, E2) PyTorch Linear layout, w_out: (D, E2+D), b_out: (D,)."""
    del mask  # reference semantics: masked_fill result is discarded (no-op)
    B, T, D = output.shape
    _, S, E2 = context.shape
    assert w_in.shape == (D, E2) and w_out.shape == (D, E2 + D) and b_out.shape == (D,)

    if block_b is None:
        block_b = _pick_block_b(B, T)
    assert B % block_b == 0, "batch must be divisible by the batch block"
    nb = B // block_b
    assert (block_b * T) % 8 == 0 or nb == 1, (
        "output tile rows must be a multiple of 8 (or cover the whole batch)")

    cdt = jnp.dtype(compute_dtype)
    out_c = output.astype(cdt)
    ctx_c = context.astype(cdt)
    w_in_t = jnp.transpose(w_in).astype(cdt)      # (E2, D)
    w_out_t = jnp.transpose(w_out)                # (E2+D, D)
    w_out_a = w_out_t[:E2].astype(cdt)            # (E2, D) multiplies weighted ctx
    w_out_b = w_out_t[E2:].astype(cdt)            # (D, D)  multiplies decoder out
    b_out_2d = b_out.reshape(1, D).astype(jnp.float32)

    # Advisory cost estimate for XLA's scheduler.
    flops = 2 * B * (S * E2 * D + T * D * S + T * S * E2 + T * (E2 + D) * D)
    transcendentals = B * T * S + B * T * D          # exp + tanh
    bytes_accessed = (cdt.itemsize * (B * T * D + B * S * E2
                                      + E2 * D + (E2 + D) * D)
                      + 4 * (D + B * T * (D + S)))
    cost = pl.CostEstimate(flops=flops, transcendentals=transcendentals,
                           bytes_accessed=bytes_accessed)

    slab = pl.pallas_call(
        attention_kernel,
        out_shape=jax.ShapeDtypeStruct((B * T, D + S), jnp.float32),
        grid_spec=pltpu.PrefetchScalarGridSpec(
            num_scalar_prefetch=0,
            grid=(nb,),
            in_specs=[
                pl.BlockSpec((block_b, T, D), lambda b: (b, 0, 0)),   # output
                pl.BlockSpec((block_b, S, E2), lambda b: (b, 0, 0)),  # context
                pl.BlockSpec((E2, D), lambda b: (0, 0)),              # W_in^T
                pl.BlockSpec((E2, D), lambda b: (0, 0)),              # W_out^T (ctx rows)
                pl.BlockSpec((D, D), lambda b: (0, 0)),               # W_out^T (out rows)
                pl.BlockSpec((1, D), lambda b: (0, 0)),               # bias
            ],
            out_specs=pl.BlockSpec((block_b * T, D + S), lambda b: (b, 0)),
        ),
        compiler_params=pltpu.CompilerParams(
            dimension_semantics=("parallel",)),
        cost_estimate=cost,
    )(out_c, ctx_c, w_in_t, w_out_a, w_out_b, b_out_2d)

    # Free splits/reshapes back to the PyTorch (B, T, ...) layout.
    y = slab[:, :D].reshape(B, T, D)
    attn = slab[:, D:].reshape(B, T, S)
    return y, attn


def attention_reference(output, context, mask, w_in, w_out, b_out):
    """Pure-JAX reference matching the PyTorch forward exactly."""
    del mask  # masked_fill in the reference is a no-op (result discarded)
    ctx_in = jnp.einsum("bse,de->bsd", context, w_in)
    scores = jnp.einsum("btd,bsd->bts", output, ctx_in)
    attn = jax.nn.softmax(scores, axis=-1)
    ctx2 = jnp.einsum("bts,bse->bte", attn, context)
    cat = jnp.concatenate([ctx2, output], axis=-1)
    y = jnp.tanh(jnp.einsum("btf,df->btd", cat, w_out) + b_out)
    return y, attn


if __name__ == "__main__":
    enc_hidden = 16
    dec_hidden = 32
    B, T, S = 2, 8, 8
    E2 = 2 * enc_hidden

    key = jax.random.PRNGKey(0)
    k1, k2, k3, k4, k5, k6 = jax.random.split(key, 6)

    output = jax.random.normal(k1, (B, T, dec_hidden), dtype=jnp.float32)
    context = jax.random.normal(k2, (B, S, E2), dtype=jnp.float32)
    mask = jax.random.bernoulli(k3, 0.2, (B, T, S))  # unused (see NOTE)

    # PyTorch Linear layout: (out_features, in_features).
    w_in = jax.random.uniform(k4, (dec_hidden, E2), jnp.float32, -0.1, 0.1)
    w_out = jax.random.uniform(k5, (dec_hidden, E2 + dec_hidden), jnp.float32,
                               -0.1, 0.1)
    b_out = jax.random.uniform(k6, (dec_hidden,), jnp.float32, -0.1, 0.1)

    y_ref, attn_ref = attention_reference(output, context, mask, w_in, w_out, b_out)

    # f32 path: exact parity with the reference (exact-divide softmax).
    y, attn = attention_forward(output, context, mask, w_in, w_out, b_out)
    jax.block_until_ready((y, attn))
    assert jnp.allclose(y, y_ref, atol=1e-4), "output mismatch (f32)"
    assert jnp.allclose(attn, attn_ref, atol=1e-4), "attn mismatch (f32)"

    # bf16 MXU-operand path: half the HBM traffic, f32 accumulation (loose check).
    y16, attn16 = attention_forward(output, context, mask, w_in, w_out, b_out,
                                    compute_dtype=jnp.bfloat16)
    jax.block_until_ready((y16, attn16))
    assert jnp.allclose(y16, y_ref, atol=1e-1), "output mismatch (bf16)"
    assert jnp.allclose(attn16, attn_ref, atol=1e-1), "attn mismatch (bf16)"

    print("KERNEL_OK")
</pallas_src>

<mosaic_0001>
module attributes {stable_mosaic.version = 11 : i64} {
  func.func @attention_kernel(%arg0: i32, %arg1: memref<1x8x32xf32, #tpu.memory_space<vmem>>, %arg2: memref<1x8x32xf32, #tpu.memory_space<vmem>>, %arg3: memref<32x32xf32, #tpu.memory_space<vmem>>, %arg4: memref<32x32xf32, #tpu.memory_space<vmem>>, %arg5: memref<32x32xf32, #tpu.memory_space<vmem>>, %arg6: memref<1x32xf32, #tpu.memory_space<vmem>>, %arg7: memref<8x40xf32, #tpu.memory_space<vmem>>) attributes {dimension_semantics = [#tpu.dimension_semantics<parallel>], iteration_bounds = array<i64: 2>, scalar_prefetch = 0 : i64, scratch_operands = 0 : i64, tpu.core_type = #tpu.core_type<tc>, window_params = [{transform_indices = @transform_0, window_bounds = array<i64: 1, 8, 32>}, {transform_indices = @transform_1, window_bounds = array<i64: 1, 8, 32>}, {pipeline_mode = #tpu.pipeline_mode<synchronous>, transform_indices = @transform_2, window_bounds = array<i64: 32, 32>}, {pipeline_mode = #tpu.pipeline_mode<synchronous>, transform_indices = @transform_3, window_bounds = array<i64: 32, 32>}, {pipeline_mode = #tpu.pipeline_mode<synchronous>, transform_indices = @transform_4, window_bounds = array<i64: 32, 32>}, {pipeline_mode = #tpu.pipeline_mode<synchronous>, transform_indices = @transform_5, window_bounds = array<i64: 1, 32>}, {transform_indices = @transform_6, window_bounds = array<i64: 8, 40>}]} {
    %c0 = arith.constant 0 : index
    %c0_0 = arith.constant 0 : index
    %c0_1 = arith.constant 0 : index
    %0 = vector.load %arg1[%c0, %c0_0, %c0_1] : memref<1x8x32xf32, #tpu.memory_space<vmem>>, vector<1x8x32xf32>
    %c0_2 = arith.constant 0 : index
    %c0_3 = arith.constant 0 : index
    %c0_4 = arith.constant 0 : index
    %1 = vector.load %arg2[%c0_2, %c0_3, %c0_4] : memref<1x8x32xf32, #tpu.memory_space<vmem>>, vector<1x8x32xf32>
    %2 = vector.shape_cast %1 : vector<1x8x32xf32> to vector<8x32xf32>
    %c0_5 = arith.constant 0 : index
    %c0_6 = arith.constant 0 : index
    %3 = vector.load %arg3[%c0_5, %c0_6] : memref<32x32xf32, #tpu.memory_space<vmem>>, vector<32x32xf32>
    %cst = arith.constant dense<0.000000e+00> : vector<8x32xf32>
    %4 = tpu.matmul %2, %3, %cst {dimension_numbers = #tpu.dot_dimension_numbers<[1], [0], [0], [1], [0, 0, 1, 1], [], []>} : vector<8x32xf32>, vector<32x32xf32>, vector<8x32xf32> -> vector<8x32xf32>
    %5 = vector.shape_cast %4 : vector<8x32xf32> to vector<1x8x32xf32>
    "tpu.trace_start"() <{level = 10 : i32, message = "btd,bsd->bts"}> : () -> ()
    %cst_7 = arith.constant dense<0.000000e+00> : vector<1x8x8xf32>
    %6 = tpu.matmul %0, %5, %cst_7 {dimension_numbers = #tpu.dot_dimension_numbers<[2], [2], [1], [1], [0, 0, 0, 1, 1, 1], [0], [0]>} : vector<1x8x32xf32>, vector<1x8x32xf32>, vector<1x8x8xf32> -> vector<1x8x8xf32>
    "tpu.trace_stop"() : () -> ()
    %cst_8 = arith.constant dense<0xFF800000> : vector<1x8xf32>
    %7 = vector.multi_reduction <maximumf>, %6, %cst_8 [2] : vector<1x8x8xf32> to vector<1x8xf32>
    %8 = vector.shape_cast %7 : vector<1x8xf32> to vector<1x8x1xf32>
    %9 = vector.broadcast %8 : vector<1x8x1xf32> to vector<1x8x8xf32>
    %10 = arith.subf %6, %9 : vector<1x8x8xf32>
    %11 = math.exp %10 : vector<1x8x8xf32>
    %cst_9 = arith.constant dense<0.000000e+00> : vector<1x8xf32>
    %12 = vector.multi_reduction <add>, %11, %cst_9 [2] : vector<1x8x8xf32> to vector<1x8xf32>
    %13 = vector.shape_cast %12 : vector<1x8xf32> to vector<1x8x1xf32>
    %14 = vector.broadcast %13 : vector<1x8x1xf32> to vector<1x8x8xf32>
    %15 = arith.divf %11, %14 : vector<1x8x8xf32>
    "tpu.trace_start"() <{level = 10 : i32, message = "bts,bse->bte"}> : () -> ()
    %cst_10 = arith.constant dense<0.000000e+00> : vector<1x8x32xf32>
    %16 = tpu.matmul %15, %1, %cst_10 {dimension_numbers = #tpu.dot_dimension_numbers<[2], [1], [1], [2], [0, 0, 0, 1, 1, 2], [0], [0]>} : vector<1x8x8xf32>, vector<1x8x32xf32>, vector<1x8x32xf32> -> vector<1x8x32xf32>
    "tpu.trace_stop"() : () -> ()
    %17 = vector.shape_cast %16 : vector<1x8x32xf32> to vector<8x32xf32>
    %c0_11 = arith.constant 0 : index
    %c0_12 = arith.constant 0 : index
    %18 = vector.load %arg4[%c0_11, %c0_12] : memref<32x32xf32, #tpu.memory_space<vmem>>, vector<32x32xf32>
    %cst_13 = arith.constant dense<0.000000e+00> : vector<8x32xf32>
    %19 = tpu.matmul %17, %18, %cst_13 {dimension_numbers = #tpu.dot_dimension_numbers<[1], [0], [0], [1], [0, 0, 1, 1], [], []>} : vector<8x32xf32>, vector<32x32xf32>, vector<8x32xf32> -> vector<8x32xf32>
    %20 = vector.shape_cast %0 : vector<1x8x32xf32> to vector<8x32xf32>
    %c0_14 = arith.constant 0 : index
    %c0_15 = arith.constant 0 : index
    %21 = vector.load %arg5[%c0_14, %c0_15] : memref<32x32xf32, #tpu.memory_space<vmem>>, vector<32x32xf32>
    %cst_16 = arith.constant dense<0.000000e+00> : vector<8x32xf32>
    %22 = tpu.matmul %20, %21, %cst_16 {dimension_numbers = #tpu.dot_dimension_numbers<[1], [0], [0], [1], [0, 0, 1, 1], [], []>} : vector<8x32xf32>, vector<32x32xf32>, vector<8x32xf32> -> vector<8x32xf32>
    %23 = arith.addf %19, %22 : vector<8x32xf32>
    %c0_17 = arith.constant 0 : index
    %c0_18 = arith.constant 0 : index
    %24 = vector.load %arg6[%c0_17, %c0_18] : memref<1x32xf32, #tpu.memory_space<vmem>>, vector<1x32xf32>
    %25 = vector.broadcast %24 : vector<1x32xf32> to vector<8x32xf32>
    %26 = arith.addf %23, %25 : vector<8x32xf32>
    %27 = math.tanh %26 : vector<8x32xf32>
    %28 = vector.shape_cast %15 : vector<1x8x8xf32> to vector<8x8xf32>
    %29 = tpu.concatenate %27, %28 in 1 : vector<8x32xf32>, vector<8x8xf32> -> vector<8x40xf32>
    %c0_19 = arith.constant 0 : index
    %c0_20 = arith.constant 0 : index
    %30 = vector.load %arg7[%c0_19, %c0_20] : memref<8x40xf32, #tpu.memory_space<vmem>>, vector<8x40xf32>
    tpu.vector_store %arg7[%c0_19, %c0_20], %29 {strides = array<i32>} : memref<8x40xf32, #tpu.memory_space<vmem>>, vector<8x40xf32>,
    return
  }
  func.func @transform_0(%arg0: i32) -> (i32, i32, i32) {
    %c0_i32 = arith.constant 0 : i32
    %c0_i32_0 = arith.constant 0 : i32
    %c0_i32_1 = arith.constant 0 : i32
    return %arg0, %c0_i32, %c0_i32_0 : i32, i32, i32
  }
  func.func @transform_1(%arg0: i32) -> (i32, i32, i32) {
    %c0_i32 = arith.constant 0 : i32
    %c0_i32_0 = arith.constant 0 : i32
    %c0_i32_1 = arith.constant 0 : i32
    return %arg0, %c0_i32, %c0_i32_0 : i32, i32, i32
  }
  func.func @transform_2(%arg0: i32) -> (i32, i32) {
    %c0_i32 = arith.constant 0 : i32
    %c0_i32_0 = arith.constant 0 : i32
    %c0_i32_1 = arith.constant 0 : i32
    return %c0_i32, %c0_i32_0 : i32, i32
  }
  func.func @transform_3(%arg0: i32) -> (i32, i32) {
    %c0_i32 = arith.constant 0 : i32
    %c0_i32_0 = arith.constant 0 : i32
    %c0_i32_1 = arith.constant 0 : i32
    return %c0_i32, %c0_i32_0 : i32, i32
  }
  func.func @transform_4(%arg0: i32) -> (i32, i32) {
    %c0_i32 = arith.constant 0 : i32
    %c0_i32_0 = arith.constant 0 : i32
    %c0_i32_1 = arith.constant 0 : i32
    return %c0_i32, %c0_i32_0 : i32, i32
  }
  func.func @transform_5(%arg0: i32) -> (i32, i32) {
    %c0_i32 = arith.constant 0 : i32
    %c0_i32_0 = arith.constant 0 : i32
    %c0_i32_1 = arith.constant 0 : i32
    return %c0_i32, %c0_i32_0 : i32, i32
  }
  func.func @transform_6(%arg0: i32) -> (i32, i32) {
    %c0_i32 = arith.constant 0 : i32
    %c0_i32_0 = arith.constant 0 : i32
    return %arg0, %c0_i32 : i32, i32
  }
}

</mosaic_0001>

<bundles_post_ra>
// kernel: tpu_custom_call.1
= control target key start
LH: loop header
LB: loop body
LE: loop exit
PB: predicated region body
PF: predicated region fallthrough
CT: control target
= control target key end

     0   :  { %s1253_s0 = inlined_call_operand.hbm [shape: f32[2,8,32], index: 0, kind: input, shape index: {}]   ;;  %s1254_s1 = inlined_call_operand.hbm [shape: f32[2,8,32], index: 1, kind: input, shape index: {}]   ;;  %s1255_s2 = inlined_call_operand.hbm [shape: f32[32,32], index: 2, kind: input, shape index: {}]   ;;  %s1256_s3 = inlined_call_operand.hbm [shape: f32[32,32], index: 3, kind: input, shape index: {}]   ;;  %s1257_s4 = inlined_call_operand.hbm [shape: f32[32,32], index: 4, kind: input, shape index: {}]   ;;  %s1258_s5 = inlined_call_operand.vmem [shape: f32[1,32], index: 5, kind: input, shape index: {}]   ;;  %s1259_s6 = inlined_call_operand.hbm [shape: f32[16,40], index: 6, kind: output, shape index: {}]  }
   0x1   :  { %1261 = sst [smem:[#allocation19_spill]] %s1255_s2 }
   0x2   :  { %1262 = sst [smem:[#allocation20_spill]] %s1256_s3 }
   0x3   :  { %1263 = sst [smem:[#allocation21_spill]] %s1257_s4 }
   0x4   :  { %11 = vsyncpa [#allocation3], 0 }
   0x5   :  { %13 = vsyncpa [#allocation3 + $0x1], 0 }
   0x6   :  { %14 = vsyncpa [#allocation6], 0 }
   0x7   :  { %16 = vsyncpa [#allocation6 + $0x1], 0 }
   0x8   :  { %17 = vsyncpa [#allocation9], 0 }
   0x9   :  { %18 = vsyncpa [#allocation4], 0 }
   0xa   :  { %20 = vsyncpa [#allocation4 + $0x1], 0  ;;  %s1051_s21 = smov 0   ;;  %s1053_s22 = smov 0  }
   0xb   :  { %s1055_s23 = smov 0   ;;  %s1057_s24 = smov 0  }
   0xc LB: > { %1264 = sst [smem:[#allocation17_spill]] %s1004_s23  ;;  %s1075_s28 = sadd.s32 4294967295, %s1008_s24   ;;  %s1008_s24 = sphi %s1057_s24, %s1281_s24   ;;  %s1004_s23 = sphi %s1055_s23, %s1278_s23   ;;  %s1000_s22 = sphi %s1053_s22, %s1280_s22   ;;  %s996_s21 = sphi %s1051_s21, %s1279_s21  }
   0xd   : > { %s1265_s2 = sld [smem:[#allocation19_spill]]  ;;  %p662_p0 = scmp.ge.s32.totalorder %s1008_s24, 1 }
   0xe   : > { %p47_p1 = scmp.eq.s32.totalorder %s1075_s28, 0  ;;  %p193_p2 = scmp.lt.s32.totalorder %s1008_s24, 3 }
   0xf   : > { %s1010_s30 = smov [#allocation7]   ;;  %s1267_s3 = sld [smem:[#allocation20_spill]] }
  0x10   : > { %p1080_p3 = pnand %p662_p0, %p193_p2  ;;  %s206_s7 = sshll.u32 %s1010_s30, 4  ;;  %s207_s7 = int_to_ptr.vmem [resolvable:$true] %s206_s7 }
  0x11   : > { %s1269_s4 = sld [smem:[#allocation21_spill]]  ;;  %s1011_s15 = smov [#allocation8]  }
  0x12   : > { %p706_p4 = pneg %p1080_p3  ;;  %s220_s16 = sshll.u32 %s1011_s15, 4  ;;  %s221_s16 = int_to_ptr.vmem [resolvable:$true] %s220_s16 }
  0x13   : > { %s204_s27 = sshll.u32 %s1265_s2, 4  ;;  %s1012_s17 = smov 128   ;;  %s205_s27 = int_to_ptr.hbm [resolvable:$true] %s204_s27 }
  0x14   : > { %p1092_p6 = pnand %p706_p4, %p47_p1  ;;  %s1013_s18 = smov 8  }
  0x15   : > { %s218_s10 = sshll.u32 %s1267_s3, 4  ;;  %s1014_s19 = smov [#allocation10]   ;;  %s219_s10 = int_to_ptr.hbm [resolvable:$true] %s218_s10 }
  0x16   : > { %709 = dma.hbm_to_vmem [thread:$0]  (!%p1092_p6), %s205_s27, 512, %s207_s7, [#allocation6], %s1012_s17, %s1012_s17, %s1013_s18  }
  0x17   : > { %s232_s14 = sshll.u32 %s1269_s4, 4  ;;  %s234_s20 = sshll.u32 %s1014_s19, 4  ;;  %s233_s14 = int_to_ptr.hbm [resolvable:$true] %s232_s14  ;;  %s235_s20 = int_to_ptr.vmem [resolvable:$true] %s234_s20 }
  0x18   : > { %712 = dma.hbm_to_vmem [thread:$0]  (!%p1092_p6), %s219_s10, 512, %s221_s16, [#allocation9], %s1012_s17, %s1012_s17, %s1013_s18  }
  0x19   : > { %715 = dma.hbm_to_vmem [thread:$0]  (!%p1092_p6), %s233_s14, 512, %s235_s20, [#allocation9], %s1012_s17, %s1012_s17, %s1013_s18  }
  0x1a   : > { %s661_s25 = sadd.s32 4294967294, %s1008_s24   ;;  %s1107_s26 = sadd.s32 1, %s1008_s24  }
  0x1b   : > { %s33_s30 = sadd.s32 1, %s1004_s23  ;;  %s30_s27 = ssub.s32 %s1008_s24, %s1107_s26 }
  0x1c   : > { %p40_p7 = scmp.ne.s32.totalorder %s1004_s23, %s1000_s22  ;;  %p31_p8 = scmp.eq.s32.totalorder %s30_s27, 0 }
  0x1d   : > { %p41_p9 = scmp.eq.s32.totalorder %s1008_s24, 0  ;;  %p46_p10 = scmp.ne.s32.totalorder %s1000_s22, %s996_s21 }
  0x1e   : > { %p180_p11 = scmp.eq.s32.totalorder %s1075_s28, 1  ;;  %p186_p2 = scmp.eq.s32.totalorder %s661_s25, 1 }
  0x1f   : > { %s1119_s7 = scalar_select %p31_p8, %s1004_s23, %s33_s30  }
  0x20   : > { %p1121_p12 = por %p41_p9, %p40_p7  ;;  %p1127_p13 = por %p47_p1, %p46_p10 }
  0x21   : > { %1270 = sst [smem:[#allocation18_spill]] %s1119_s7  ;;  %p1131_p0 = por %p180_p11, %p40_p7 }
  0x22   : > { %p730_p4 = scmp.lt.s32.totalorder %s1008_s24, 2  ;;  %s251_s11 = sand.u32 1, %s1004_s23  }
  0x23   : > { %p1137_p6 = por %p186_p2, %p46_p10  ;;  %s667_s13 = sshll.u32 %s251_s11, 3 }
  0x24   : > { %s668_s14 = sshll.u32 %s1008_s24, 3  ;;  %s255_s19 = scalar_lea.vmem [#allocation2], %s667_s13 }
  0x25   : > { %s259_s17 = scalar_lea.hbm %s1253_s0, %s668_s14  ;;  %s263_s20 = sshll.u32 %s255_s19, 4  ;;  %s264_s20 = int_to_ptr.vmem [resolvable:$true] %s263_s20 }
  0x26   : > { %s261_s18 = sshll.u32 %s259_s17, 4  ;;  %p1147_p7 = pnand %p730_p4, %p1121_p12  ;;  %s262_s18 = int_to_ptr.hbm [resolvable:$true] %s261_s18 }
  0x27   : > { %s278_s2 = scalar_lea.hbm %s1254_s1, %s668_s14  ;;  %s270_s3 = sand.u32 1, %s1008_s24  }
  0x28   : > { %s252_s4 = scalar_lea.sflag [#allocation3], %s251_s11  ;;  %s870_s15 = sshra.s32 %s262_s18, 4  ;;  %s871_s15 = int_to_ptr.hbm [resolvable:$true] %s870_s15 }
  0x29   : > { %s872_s16 = scalar_lea.hbm %s871_s15, 8  ;;  %p874_p9 = pneg %p1147_p7 }
  0x2a   : > { %p873_p8 = scmp.ne.s32.totalorder %s871_s15, %s872_s16  ;;  %s877_s19 = scalar_lea.hbm %s1253_s0, 16 }
  0x2b   : > { %p878_p12 = scmp.lt.s32.totalorder %s871_s15, %s1253_s0  ;;  %p879_p2 = scmp.lt.s32.totalorder %s877_s19, %s872_s16 }
  0x2c   : > { %p875_p10 = pnand %p874_p9, %p873_p8 }
  0x2d   : > { %p880_p4 = por %p879_p2, %p878_p12 }
  0x2e   : > { %p876_p11 = pneg %p875_p10 }
  0x30   : > { %p881_p5 = pnand %p880_p4, %p876_p11 }
  0x32   : > { %884 = shalt.err (!%p881_p5)
}
  0x33   : > { %719 = dma.hbm_to_vmem [thread:$0]  (!%p1147_p7), %s262_s18, 128, %s264_s20, %s252_s4  }
  0x34   : > { %s280_s11 = sshll.u32 %s278_s2, 4  ;;  %s274_s14 = scalar_lea.vmem [#allocation5], %s667_s13  ;;  %s281_s11 = int_to_ptr.hbm [resolvable:$true] %s280_s11 }
  0x35   : > { %s282_s7 = sshll.u32 %s274_s14, 4  ;;  %s271_s23 = scalar_lea.sflag [#allocation6], %s270_s3  ;;  %s283_s7 = int_to_ptr.vmem [resolvable:$true] %s282_s7 }
  0x36   : > { %s900_s8 = sshra.s32 %s281_s11, 4  ;;  %s907_s19 = scalar_lea.hbm %s1254_s1, 16  ;;  %s901_s8 = int_to_ptr.hbm [resolvable:$true] %s900_s8 }
  0x37   : > { %s902_s17 = scalar_lea.hbm %s901_s8, 8  ;;  %p908_p5 = scmp.lt.s32.totalorder %s901_s8, %s1254_s1 }
  0x38   : > { %p903_p8 = scmp.ne.s32.totalorder %s901_s8, %s902_s17  ;;  %p909_p11 = scmp.lt.s32.totalorder %s907_s19, %s902_s17 }
  0x3a   : > { %p905_p10 = pnand %p903_p8, %p874_p9  ;;  %p910_p2 = por %p909_p11, %p908_p5 }
  0x3c   : > { %p906_p12 = pneg %p905_p10 }
  0x3e   : > { %p911_p4 = pnand %p910_p2, %p906_p12 }
  0x40   : > { %914 = shalt.err (!%p911_p4)
}
  0x41   : > { %722 = dma.hbm_to_vmem [thread:$0]  (!%p1147_p7), %s281_s11, 128, %s283_s7, %s271_s23  }
  0x42   : > { %291 = sbr.rel (%p1080_p3) target bundleno = 885 (0x375), region = 44  ;;  %s1182_s2 = sand.u32 (!%p1080_p3), 1, %s1000_s22  }
  0x43   : > { %s1185_s3 = sshll.u32 (!%p1080_p3), %s1182_s2, 3  ;;  %s294_s13 = scalar_lea.sflag (!%p1080_p3), [#allocation3], %s1182_s2 }
  0x44   : > { %s297_s18 = scalar_lea.vmem (!%p1080_p3), [#allocation2], %s1185_s3 }
  0x47   : > { %975 = dma.done.wait (%p1127_p13), %s294_s13, 128  }
  0x48   : > { %977 = vsyncadd (%p1127_p13), %s294_s13, 4294967168  ;;  %s303_s23 = sand.u32 1, %s1075_s28   ;;  %s307_s7 = scalar_lea.vmem [#allocation5], %s1185_s3 }
  0x49   : > { %s304_s29 = scalar_lea.sflag [#allocation6], %s303_s23 }
  0x4a   : > { %979 = dma.done.wait (%p1127_p13), %s304_s29, 128  }
  0x4b   : > { %981 = vsyncadd (%p1127_p13), %s304_s29, 4294967168 }
  0x4c   : > { %983 = dma.done.wait (%p47_p1), [#allocation6], 512  }
  0x4d   : > { %985 = vsyncadd (%p47_p1), [#allocation6], 4294966784 }
  0x4e   : > { %987 = dma.done.wait (%p47_p1), [#allocation9], 1024  }
  0x4f   : > { %989 = vsyncadd (%p47_p1), [#allocation9], 4294966272  ;;  %v362_v0 = vld [vmem:[#allocation7 + $0x18] sm:$0xff]  ;;  %v361_v1 = vld [vmem:[#allocation7 + $0x10] sm:$0xff]  ;;  %vm363_vm0 = vcmask 261120   ;;  %vm413_vm1 = vcmask 64512  }
  0x50   : > { %379 = vmatpush.msra.mxu0 %v362_v0  ;;  %v358_v2 = vld [vmem:[%s307_s7] sm:$0xff]  ;;  %v360_v3 = vld [vmem:[#allocation7 + $0x8] sm:$0xff]  ;;  %v359_v4 = vld [vmem:[#allocation7] sm:$0xff]  ;;  %s1015_s9 = smov 32   ;;  %s685_s27 = sshll.u32 %s1075_s28, 3  ;;  %vm522_vm6 = vcmask 326656  }
  0x51   : > { %456 = vmatpush.msra.mxu2 %v358_v2  ;;  %v357_v6 = vld [vmem:[%s297_s18] sm:$0xff]  ;;  %v464_v26 = vld [vmem:[#allocation8 + $0x18] sm:$0xff]  ;;  %v463_v28 = vld [vmem:[#allocation8 + $0x10] sm:$0xff]  ;;  %s535_s8 = scalar_lea.hbm %s1259_s6, %s685_s27  ;;  %s356_s17 = scalar_lea.vmem [#allocation11], %s1185_s3 }
  0x52   : > { %380 = vmatpush.msra.mxu0 %v361_v1  ;;  %v468_v27 = vld [vmem:[#allocation10 + $0x18] sm:$0xff]  ;;  %v467_v29 = vld [vmem:[#allocation10 + $0x10] sm:$0xff]  ;;  %v462_v30 = vld [vmem:[#allocation8 + $0x8] sm:$0xff]  ;;  %s537_s15 = sshll.u32 %s356_s17, 4  ;;  %s539_s16 = sshll.u32 %s535_s8, 4  ;;  %s538_s15 = int_to_ptr.vmem [resolvable:$true] %s537_s15  ;;  %s540_s16 = int_to_ptr.hbm [resolvable:$true] %s539_s16 }
  0x53   : > { %504 = vmatpush.msrb.mxu2 %v464_v26  ;;  %481 = vmatpush.msra.mxu3 %v468_v27  ;;  %v466_v31 = vld [vmem:[#allocation10 + $0x8] sm:$0xff]  ;;  %v461_v32 = vld [vmem:[#allocation8] sm:$0xff]  ;;  %s525_s19 = scalar_lea.sflag [#allocation4], %s1182_s2  ;;  %s944_s28 = sshra.s32 %s540_s16, 4  ;;  %s945_s28 = int_to_ptr.hbm [resolvable:$true] %s944_s28 }
  0x54   : > { %381 = vmatpush.msra.mxu0 %v360_v3  ;;  %v465_v33 = vld [vmem:[#allocation10] sm:$0xff]  ;;  %s946_s30 = scalar_lea.hbm %s945_s28, 8  ;;  %s950_s13 = scalar_lea.hbm %s1259_s6, 16 }
  0x55   : > { %505 = vmatpush.msrb.mxu2 %v463_v28  ;;  %482 = vmatpush.msra.mxu3 %v467_v29  ;;  %v773_v36 = vld [vmem:[%s1258_s5] ss:$0 sm:$0xff]  ;;  %p947_p1 = scmp.ne.s32.totalorder %s945_s28, %s946_s30  ;;  %p951_p7 = scmp.lt.s32.totalorder %s945_s28, %s1259_s6 }
  0x56   : > { %382 = vmatpush.msra.mxu0 %v359_v4  ;;  %p952_p9 = scmp.lt.s32.totalorder %s950_s13, %s946_s30 }
  0x57   : > { %678 = vmatmul.msk.f32.vlgmr.msra.gmra.mxu0 %vm363_vm0, %v358_v2  ;;  %506 = vmatpush.msrb.mxu2 %v462_v30  ;;  %p948_p3 = pnand %p947_p1, %p1131_p0 }
  0x58   : > { %483 = vmatpush.msra.mxu3 %v466_v31  ;;  %p953_p8 = por %p952_p9, %p951_p7 }
  0x59   : > { %507 = vmatpush.msrb.mxu2 %v461_v32  ;;  %p949_p13 = pneg %p948_p3 }
  0x5a   : > { %484 = vmatpush.msra.mxu3 %v465_v33 }
  0x5b   : > { %682 = vmatmul.msk.f32.vlgmr.msra.gmra.mxu3 %vm363_vm0, %v357_v6  ;;  %p954_p10 = pnand %p953_p8, %p949_p13 }
  0xd4   : > { %v384_v5 = vpop.f32.mrf.mxu0 }
  0xd5   : > { %679 = vmatpush.xpose.msk.msra.mxu1 %vm363_vm0, %v384_v5 }
  0xd8   : > { %680 = vmatmul.msk.f32.vlgmr.msra.gmra.mxu1 %vm363_vm0, %v357_v6 }
  0xde   : > { %v486_v35 = vpop.f32.mrf.mxu3 }
 0x155   : > { %v410_v7 = vpop.f32.mrf.mxu1 }
 0x156   : > { %v414_v8 = vsel %vm413_vm1, %v410_v7, -inf }
 0x157   : > { %415 = vmax.xlane.f32.xlu0 %v414_v8 }
 0x1ca   : > { %v416_v9 = vpop.xlane.xlu0 %415 }
 0x1cb   : > { %v417_v10 = vsub.f32 %v410_v7, %v416_v9 }
 0x1cd   : > { %v418_v11 = vmul.f32 1.442695, %v417_v10 }
 0x1cf   : > { %774 = vpow2.f32 %v418_v11 }
 0x1d5   : > { %v775_v12 = vpop.eup %774 }
 0x1d6   : > { %v420_v13 = vsel %vm413_vm1, %v775_v12, 0.0 }
 0x1d7   : > { %421 = vadd.xlane.f32.xlu0 %v420_v13 }
 0x24a   : > { %v422_v14 = vpop.xlane.xlu0 %421 }
 0x24b   : > { %776 = vrcp.f32 %v422_v14  ;;  %v434_v18 = vand.u32 2147483648, %v422_v14  ;;  %v432_v20 = vand.u32 2147483647, %v422_v14  ;;  %vm428_vm3 = vweird.f32 %v422_v14 }
 0x24d   : > { %v435_v22 = vor.u32 1.1754944e-38, %v434_v18  ;;  %vm433_vm5 = vcmp.eq.f32.partialorder %v432_v20, 8.507059e+37 }
 0x251   : > { %v777_v15 = vpop.eup %776 }
 0x252   : > { %v424_v16 = vmul.f32 %v777_v15, %v422_v14  ;;  %vm429_vm2 = vweird.f32 %v777_v15 }
 0x253   : > { %vm430_vm4 = vmor %vm428_vm3, %vm429_vm2 }
 0x254   : > { %v425_v17 = vsub.f32 1.0, %v424_v16 }
 0x256   : > { %v426_v19 = vmul.f32 %v777_v15, %v425_v17 }
 0x258   : > { %v427_v21 = vadd.f32 %v777_v15, %v426_v19 }
 0x25a   : > { %v431_v23 = vsel %vm430_vm4, %v777_v15, %v427_v21 }
 0x25b   : > { %v436_v24 = vsel %vm433_vm5, %v435_v22, %v431_v23 }
 0x25c   : > { %v437_v25 = vmul.f32 %v775_v12, %v436_v24 }
 0x25e   : > { %518 = vrot.lane.b32.xlu1 %v437_v25, %s1015_s9  ;;  %681 = vmatmul.msk.f32.vlgmr.msra.gmra.mxu2 %vm413_vm1, %v437_v25 }
 0x2d0   : > { %v519_v41 = vpop.permute.xlu1 %518 }
 0x2e1   : > { %v458_v34 = vpop.f32.mrf.mxu2 }
 0x2e2   : > { %683 = vmatmul.msk.f32.vlgmr.msrb.gmra.mxu2 %vm363_vm0, %v458_v34 }
 0x365   : > { %v509_v37 = vpop.f32.mrf.mxu2 }
 0x366   : > { %v510_v38 = vadd.f32 %v509_v37, %v486_v35 }
 0x368   : > { %v516_v39 = vadd.f32 %v773_v36, %v510_v38 }
 0x36a   : > { %778 = vtanh.f32 %v516_v39 }
 0x370   : > { %v779_v40 = vpop.eup %778 }
 0x371   : > { %v521_v42 = vsel %vm363_vm0, %v779_v40, %v519_v41 }
 0x372   : > { %523 = vst.msk [vmem:[%s356_s17] sm:$0xff] %vm522_vm6, %v521_v42 }
 0x373   : > { %957 = shalt.err (!%p954_p10)
}
 0x374   : > { %704 = dma.vmem_to_hbm [thread:$0]  (%p1131_p0), %s538_s15, 128, %s540_s16, %s525_s19  }
 0x375 PF: > { %s551_s2 = sand.u32 1, %s996_s21   ;;  %p1276_p12 = scmp.ge.s32.totalorder %s1008_s24, 2 }
 0x376   : > { %s552_s29 = scalar_lea.sflag [#allocation4], %s551_s2 }
 0x377   : > { %p724_p5 = pnand %p1276_p12, %p1137_p6 }
 0x379   : > { %p725_p11 = pneg %p724_p5 }
 0x37b   : > { %991 = dma.done.wait (%p725_p11), %s552_s29, 128  }
 0x37c   : > { %993 = vsyncadd (%p725_p11), %s552_s29, 4294967168  ;;  %s1277_s7 = sld [smem:[#allocation17_spill]]  ;;  %p23_p2 = scmp.ge.s32.totalorder %s1107_s26, 4  }
 0x37d   : > { %s1278_s23 = sld [smem:[#allocation18_spill]]  ;;  %s1279_s21 = smov %s1000_s22 }
 0x37e   : > { %s1281_s24 = smov %s1107_s26  ;;  %25 = sbr.rel (!%p23_p2) target bundleno = 12 (0xc), region = 114 }
 0x382   : > { %s1280_s22 = smov %s1277_s7 }
 0x383   :  { %558 = vsyncpa [#allocation3], 1 }
 0x384   :  { %560 = vsyncpa [#allocation3 + $0x1], 1 }
 0x385   :  { %561 = vsyncpa [#allocation6], 1 }
 0x386   :  { %563 = vsyncpa [#allocation6 + $0x1], 1 }
 0x387   :  { %564 = vsyncpa [#allocation9], 1 }
 0x388   :  { %565 = vsyncpa [#allocation4], 1 }
 0x389   :  { %567 = vsyncpa [#allocation4 + $0x1], 1 }

</bundles_post_ra>
